<compile_context>
chip_gen: v6e
topology: v6e:2x2x1
jax: 0.10.0
libtpu: 0.0.40
codegen_flags: <defaults>
</compile_context>

<pallas_src>
import jax
import jax.numpy as jnp
from jax.experimental import pallas as pl
from jax.experimental.pallas import tpu as pltpu

_LANE = 128


def _round_up(n, m):
    return ((n + m - 1) // m) * m


def _dqn_kernel(x_ref, w1_ref, b1_ref, w2_ref, b2_ref, out_ref):
    # x:  (B, D)       w1: (D, Hp)   b1: (1, Hp)
    # w2: (Hp, Ap)     b2: (1, Ap)   out: (B, Ap)    (Hp, Ap lane-dense)
    x = x_ref[...]
    h = jnp.dot(x, w1_ref[...], preferred_element_type=jnp.float32) + b1_ref[...]
    h = jnp.maximum(h, 0.0)                          # ReLU
    h = h.astype(w2_ref.dtype)                       # bf16 fast path friendly
    out = jnp.dot(h, w2_ref[...], preferred_element_type=jnp.float32) + b2_ref[...]
    out_ref[...] = out.astype(out_ref.dtype)


def dqn_forward(x, params, action_dim):
    """Per-step inference path. x: (B, input_dim) f32 -> (B, action_dim) f32.

    Gridless pallas_call: whole (tiny) problem lives in VMEM, no pipelining.
    """
    w1p, b1p, w2p, b2p = params
    B, _ = x.shape
    Ap = w2p.shape[1]
    vmem = pl.BlockSpec(memory_space=pltpu.MemorySpace.VMEM)
    out_p = pl.pallas_call(
        _dqn_kernel,
        out_shape=jax.ShapeDtypeStruct((B, Ap), jnp.float32),
        in_specs=[vmem, vmem, vmem, vmem, vmem],
        out_specs=vmem,
    )(x, w1p, b1p, w2p, b2p)
    return out_p[:, :action_dim]


def dqn_forward_batched(x, params, action_dim, *, tb=256,
                        compute_dtype=jnp.float32):
    """Replay-batch path: grid over batch only, weights stay VMEM-resident.

    tb: batch tile (use 128 on v5e, 256+ on v6e/v7x; tiny weights => VMEM is
    never the binding constraint at these model sizes, even on v7x's 64 MiB).
    compute_dtype=jnp.bfloat16 enables the bf16 MXU fast path on v6e/v7x while
    keeping fp32 accumulation + fp32 biases/output.
    """
    w1p, b1p, w2p, b2p = params
    B, D = x.shape
    Hp = w1p.shape[1]
    Ap = w2p.shape[1]

    Bp = _round_up(B, tb)
    if Bp != B:
        x = jnp.pad(x, ((0, Bp - B), (0, 0)))
    if compute_dtype != jnp.float32:
        x = x.astype(compute_dtype)
        w1p = w1p.astype(compute_dtype)
        w2p = w2p.astype(compute_dtype)

    out_p = pl.pallas_call(
        _dqn_kernel,
        out_shape=jax.ShapeDtypeStruct((Bp, Ap), jnp.float32),
        grid=(Bp // tb,),
        in_specs=[
            pl.BlockSpec((tb, D), lambda i: (i, 0)),    # x: tiled over batch
            pl.BlockSpec((D, Hp), lambda i: (0, 0)),    # weights resident
            pl.BlockSpec((1, Hp), lambda i: (0, 0)),
            pl.BlockSpec((Hp, Ap), lambda i: (0, 0)),
            pl.BlockSpec((1, Ap), lambda i: (0, 0)),
        ],
        out_specs=pl.BlockSpec((tb, Ap), lambda i: (i, 0)),
        compiler_params=pltpu.CompilerParams(
            dimension_semantics=("parallel",)           # 2x on v7x (2 TCs)
        ),
    )(x, w1p, b1p, w2p, b2p)
    return out_p[:B, :action_dim]


def init_dqn_params(key, input_dim, action_dim, hidden=30):
    """Deterministic init mimicking PyTorch nn.Linear (uniform +-1/sqrt(fan_in)).

    Weights are stored transposed to (in, out) and zero-padded once here so the
    kernel's second matmul / bias add / output store are fully lane-dense
    (hidden -> 128, action_dim -> 128). Biases are pre-shaped to (1, Hp)/(1, Ap).
    """
    Hp = _round_up(hidden, _LANE)
    Ap = _round_up(action_dim, _LANE)

    k1, k2, k3, k4 = jax.random.split(key, 4)
    bound1 = 1.0 / jnp.sqrt(jnp.float32(input_dim))
    bound2 = 1.0 / jnp.sqrt(jnp.float32(hidden))
    w1 = jax.random.uniform(k1, (input_dim, hidden), jnp.float32, -bound1, bound1)
    b1 = jax.random.uniform(k2, (hidden,), jnp.float32, -bound1, bound1)
    w2 = jax.random.uniform(k3, (hidden, action_dim), jnp.float32, -bound2, bound2)
    b2 = jax.random.uniform(k4, (action_dim,), jnp.float32, -bound2, bound2)

    w1p = jnp.zeros((input_dim, Hp), jnp.float32).at[:, :hidden].set(w1)
    b1p = jnp.zeros((1, Hp), jnp.float32).at[:, :hidden].set(b1)
    w2p = jnp.zeros((Hp, Ap), jnp.float32).at[:hidden, :action_dim].set(w2)
    b2p = jnp.zeros((1, Ap), jnp.float32).at[:, :action_dim].set(b2)
    return w1p, b1p, w2p, b2p


if __name__ == "__main__":
    # Shapes consistent with the module's forward:
    # input_dim=16, hidden=30 (fixed by create_model), action_dim=4.
    batch, input_dim, action_dim = 8, 16, 4

    key = jax.random.PRNGKey(0)
    kx, kp = jax.random.split(key)
    x = jax.random.normal(kx, (batch, input_dim), dtype=jnp.float32)
    params = init_dqn_params(kp, input_dim, action_dim)
    w1p, b1p, w2p, b2p = params

    # Pure-JAX reference of the same math (zero padding contributes exactly 0).
    def ref_fn(xi):
        return (jnp.maximum(xi @ w1p + b1p, 0.0) @ w2p + b2p)[:, :action_dim]

    # 1) Per-step inference path (gridless, all-VMEM).
    out = jax.block_until_ready(dqn_forward(x, params, action_dim))
    assert out.shape == (batch, action_dim)
    assert jnp.allclose(out, ref_fn(x), atol=1e-5, rtol=1e-5)

    # 2) Replay-batch path (grid over batch, weights resident, parallel axis).
    xb = jax.random.normal(jax.random.PRNGKey(1), (300, input_dim), jnp.float32)
    outb = jax.block_until_ready(dqn_forward_batched(xb, params, action_dim, tb=256))
    assert outb.shape == (300, action_dim)
    assert jnp.allclose(outb, ref_fn(xb), atol=1e-5, rtol=1e-5)

    # 3) Same path with bf16 MXU fast path (fp32 accumulation).
    outb16 = jax.block_until_ready(
        dqn_forward_batched(xb, params, action_dim, tb=256,
                            compute_dtype=jnp.bfloat16))
    assert jnp.allclose(outb16, ref_fn(xb), atol=5e-2, rtol=5e-2)

    # TODO(synk): epsilon-greedy action selection (argmax) could be fused into
    # the kernel to remove one more dispatch per environment step.
    print("KERNEL_OK")
</pallas_src>

<mosaic_0001>
module attributes {stable_mosaic.version = 11 : i64} {
  func.func @_dqn_kernel(%arg0: memref<8x16xf32, #tpu.memory_space<vmem>>, %arg1: memref<16x128xf32, #tpu.memory_space<vmem>>, %arg2: memref<1x128xf32, #tpu.memory_space<vmem>>, %arg3: memref<128x128xf32, #tpu.memory_space<vmem>>, %arg4: memref<1x128xf32, #tpu.memory_space<vmem>>, %arg5: memref<8x128xf32, #tpu.memory_space<vmem>>) attributes {dimension_semantics = [], scalar_prefetch = 0 : i64, scratch_operands = 0 : i64, tpu.core_type = #tpu.core_type<tc>} {
    %c0 = arith.constant 0 : index
    %c0_0 = arith.constant 0 : index
    %0 = vector.load %arg0[%c0, %c0_0] : memref<8x16xf32, #tpu.memory_space<vmem>>, vector<8x16xf32>
    %c0_1 = arith.constant 0 : index
    %c0_2 = arith.constant 0 : index
    %1 = vector.load %arg1[%c0_1, %c0_2] : memref<16x128xf32, #tpu.memory_space<vmem>>, vector<16x128xf32>
    %cst = arith.constant dense<0.000000e+00> : vector<8x128xf32>
    %2 = tpu.matmul %0, %1, %cst {dimension_numbers = #tpu.dot_dimension_numbers<[1], [0], [0], [1], [0, 0, 1, 1], [], []>} : vector<8x16xf32>, vector<16x128xf32>, vector<8x128xf32> -> vector<8x128xf32>
    %c0_3 = arith.constant 0 : index
    %c0_4 = arith.constant 0 : index
    %3 = vector.load %arg2[%c0_3, %c0_4] : memref<1x128xf32, #tpu.memory_space<vmem>>, vector<1x128xf32>
    %4 = vector.broadcast %3 : vector<1x128xf32> to vector<8x128xf32>
    %5 = arith.addf %2, %4 : vector<8x128xf32>
    %cst_5 = arith.constant 0.000000e+00 : f32
    %6 = vector.broadcast %cst_5 : f32 to vector<8x128xf32>
    %7 = arith.maximumf %5, %6 : vector<8x128xf32>
    %c0_6 = arith.constant 0 : index
    %c0_7 = arith.constant 0 : index
    %8 = vector.load %arg3[%c0_6, %c0_7] : memref<128x128xf32, #tpu.memory_space<vmem>>, vector<128x128xf32>
    %cst_8 = arith.constant dense<0.000000e+00> : vector<8x128xf32>
    %9 = tpu.matmul %7, %8, %cst_8 {dimension_numbers = #tpu.dot_dimension_numbers<[1], [0], [0], [1], [0, 0, 1, 1], [], []>} : vector<8x128xf32>, vector<128x128xf32>, vector<8x128xf32> -> vector<8x128xf32>
    %c0_9 = arith.constant 0 : index
    %c0_10 = arith.constant 0 : index
    %10 = vector.load %arg4[%c0_9, %c0_10] : memref<1x128xf32, #tpu.memory_space<vmem>>, vector<1x128xf32>
    %11 = vector.broadcast %10 : vector<1x128xf32> to vector<8x128xf32>
    %12 = arith.addf %9, %11 : vector<8x128xf32>
    %c0_11 = arith.constant 0 : index
    %c0_12 = arith.constant 0 : index
    %13 = vector.load %arg5[%c0_11, %c0_12] : memref<8x128xf32, #tpu.memory_space<vmem>>, vector<8x128xf32>
    tpu.vector_store %arg5[%c0_11, %c0_12], %12 {strides = array<i32>} : memref<8x128xf32, #tpu.memory_space<vmem>>, vector<8x128xf32>,
    return
  }
}

</mosaic_0001>

<bundles_post_ra>
// kernel: tpu_custom_call.1
= control target key start
LH: loop header
LB: loop body
LE: loop exit
PB: predicated region body
PF: predicated region fallthrough
CT: control target
= control target key end

     0   :  { %10 = vsyncpa [#allocation3], 0  ;;  %s470_s0 = inlined_call_operand.hbm [shape: f32[8,16], index: 0, kind: input, shape index: {}]   ;;  %s471_s1 = inlined_call_operand.hbm [shape: f32[16,128], index: 1, kind: input, shape index: {}]   ;;  %s472_s2 = inlined_call_operand.vmem [shape: f32[1,128], index: 2, kind: input, shape index: {}]   ;;  %s473_s3 = inlined_call_operand.hbm [shape: f32[128,128], index: 3, kind: input, shape index: {}]   ;;  %s474_s4 = inlined_call_operand.vmem [shape: f32[1,128], index: 4, kind: input, shape index: {}]   ;;  %s475_s5 = inlined_call_operand.hbm [shape: f32[8,128], index: 5, kind: output, shape index: {}]  }
   0x1   :  { %11 = vsyncpa [#allocation6], 0 }
   0x2   :  { %12 = vsyncpa [#allocation4], 0  ;;  %s414_s18 = smov [#allocation5]  }
   0x3   :  { %s28_s19 = sshll.u32 %s414_s18, 4  ;;  %s29_s19 = int_to_ptr.vmem [resolvable:$true] %s28_s19 }
   0x4   :  { %s336_s20 = scalar_lea.vmem %s29_s19, 256  ;;  %p341_p1 = scmp.lt.s32.totalorder %s29_s19, %s29_s19 }
   0x5   :  { %p337_p0 = scmp.ne.s32.totalorder %s29_s19, %s336_s20  ;;  %p342_p2 = scmp.lt.s32.totalorder %s336_s20, %s336_s20 }
   0x7   :  { %p343_p3 = por %p342_p2, %p341_p1 }
   0x9   :  { %p344_p4 = pnand %p343_p3, %p337_p0 }
   0xb   :  { %347 = shalt.err (!%p344_p4)
}
   0xc   :  { %s415_s21 = smov 128   ;;  %s416_s22 = smov 8  }
   0xd   :  { %34 = dma.hbm_to_vmem [thread:$0]  %s471_s1, 256, %s29_s19, [#allocation6], %s415_s21, %s415_s21, %s416_s22  }
   0xe   :  { %s417_s25 = smov [#allocation2]   ;;  %s418_s27 = smov [#allocation7]  }
   0xf   :  { %s19_s26 = sshll.u32 %s417_s25, 4  ;;  %s42_s28 = sshll.u32 %s418_s27, 4  ;;  %s20_s26 = int_to_ptr.vmem [resolvable:$true] %s19_s26  ;;  %s43_s28 = int_to_ptr.vmem [resolvable:$true] %s42_s28 }
  0x10   :  { %s356_s29 = scalar_lea.vmem %s20_s26, 128  ;;  %p361_p6 = scmp.lt.s32.totalorder %s20_s26, %s20_s26 }
  0x11   :  { %p357_p5 = scmp.ne.s32.totalorder %s20_s26, %s356_s29  ;;  %p362_p7 = scmp.lt.s32.totalorder %s356_s29, %s356_s29 }
  0x13   :  { %p363_p8 = por %p362_p7, %p361_p6 }
  0x15   :  { %p364_p9 = pnand %p363_p8, %p357_p5 }
  0x17   :  { %367 = shalt.err (!%p364_p9)
}
  0x18   :  { %22 = dma.hbm_to_vmem [thread:$0]  %s470_s0, 128, %s20_s26, [#allocation3]  }
  0x19   :  { %s376_s7 = scalar_lea.vmem %s43_s28, 2048  ;;  %p381_p11 = scmp.lt.s32.totalorder %s43_s28, %s43_s28 }
  0x1a   :  { %p377_p10 = scmp.ne.s32.totalorder %s43_s28, %s376_s7  ;;  %p382_p12 = scmp.lt.s32.totalorder %s376_s7, %s376_s7 }
  0x1c   :  { %p383_p13 = por %p382_p12, %p381_p11 }
  0x1e   :  { %p384_p0 = pnand %p383_p13, %p377_p10 }
  0x20   :  { %387 = shalt.err (!%p384_p0)
}
  0x21   :  { %48 = dma.hbm_to_vmem [thread:$0]  %s473_s3, 2048, %s43_s28, [#allocation6], %s415_s21, %s415_s21, %s416_s22  }
  0x22   :  { %408 = dma.done.wait [#allocation3], 128  }
  0x23   :  { %409 = vsyncadd [#allocation3], 4294967168 }
  0x24   :  { %410 = dma.done.wait [#allocation6], 2304  }
  0x25   :  { %411 = vsyncadd [#allocation6], 4294964992  ;;  %v419_v0 = vmov 0.0   ;;  %vm420_vm0 = vmmov 0   ;;  %v62_v1 = vld [vmem:[#allocation5 + $0x8] sm:$0xff]  ;;  %v61_v2 = vld [vmem:[#allocation5] sm:$0xff] }
  0x26   :  { %278 = vmatprep.subr.mxu0 %v419_v0  ;;  %282 = vmatprep.mubr.msk.f32.mxu0 %vm420_vm0, %v419_v0  ;;  %v60_v3 = vld [vmem:[#allocation2] sm:$0xff]  ;;  %vm70_vm1 = vcmask 130048   ;;  %v160_v4 = vld [vmem:[#allocation7 + $0x78] sm:$0xff]  ;;  %v159_v5 = vld [vmem:[#allocation7 + $0x70] sm:$0xff]  ;;  %s421_s11 = smov [#allocation8]  }
  0x27   :  { %285 = vmatprep.subr.mxu1 %v419_v0  ;;  %317 = vmatprep.mubr.msk.f32.mxu1 %vm420_vm0, %v419_v0  ;;  %v158_v6 = vld [vmem:[#allocation7 + $0x68] sm:$0xff]  ;;  %v157_v7 = vld [vmem:[#allocation7 + $0x60] sm:$0xff]  ;;  %v156_v8 = vld [vmem:[#allocation7 + $0x58] sm:$0xff]  ;;  %s245_s12 = sshll.u32 %s421_s11, 4  ;;  %s246_s12 = int_to_ptr.vmem [resolvable:$true] %s245_s12 }
  0x28   :  { %279 = vmatpush3.msra.mxu0 %v62_v1  ;;  %286 = vmatpush3.msra.mxu1 %v160_v4  ;;  %v155_v9 = vld [vmem:[#allocation7 + $0x50] sm:$0xff]  ;;  %v154_v10 = vld [vmem:[#allocation7 + $0x48] sm:$0xff]  ;;  %v153_v11 = vld [vmem:[#allocation7 + $0x40] sm:$0xff]  ;;  %s388_s13 = scalar_lea.vmem %s246_s12, 128  ;;  %p393_p2 = scmp.lt.s32.totalorder %s246_s12, %s246_s12 }
  0x29   :  { %280 = vmatprep.subr.mxu0 %v419_v0  ;;  %287 = vmatprep.subr.mxu1 %v419_v0  ;;  %v152_v12 = vld [vmem:[#allocation7 + $0x38] sm:$0xff]  ;;  %v151_v13 = vld [vmem:[#allocation7 + $0x30] sm:$0xff]  ;;  %v150_v14 = vld [vmem:[#allocation7 + $0x28] sm:$0xff]  ;;  %p389_p1 = scmp.ne.s32.totalorder %s246_s12, %s388_s13  ;;  %p394_p3 = scmp.lt.s32.totalorder %s388_s13, %s388_s13 }
  0x2a   :  { %281 = vmatpush3.msra.mxu0 %v61_v2  ;;  %288 = vmatpush3.msra.mxu1 %v159_v5  ;;  %v149_v15 = vld [vmem:[#allocation7 + $0x20] sm:$0xff]  ;;  %v148_v16 = vld [vmem:[#allocation7 + $0x18] sm:$0xff]  ;;  %v147_v17 = vld [vmem:[#allocation7 + $0x10] sm:$0xff] }
  0x2b   :  { %283 = vmatmul.mubr.msk.f32.vlgmr.msra.gmra.mxu0 %vm70_vm1, %v60_v3  ;;  %289 = vmatprep.subr.mxu1 %v419_v0  ;;  %v146_v18 = vld [vmem:[#allocation7 + $0x8] sm:$0xff]  ;;  %v145_v19 = vld [vmem:[#allocation7] sm:$0xff]  ;;  %p395_p4 = por %p394_p3, %p393_p2 }
  0x2c   :  { %290 = vmatpush3.msra.mxu1 %v158_v6  ;;  %v255_v20 = vld [vmem:[%s472_s2] ss:$0 sm:$0xff] }
  0x2d   :  { %291 = vmatprep.subr.mxu1 %v419_v0  ;;  %v257_v25 = vld [vmem:[%s474_s4] ss:$0 sm:$0xff]  ;;  %p396_p5 = pnand %p395_p4, %p389_p1 }
  0x2e   :  { %292 = vmatpush3.msra.mxu1 %v157_v7 }
  0x2f   :  { %293 = vmatprep.subr.mxu1 %v419_v0 }
  0x30   :  { %294 = vmatpush3.msra.mxu1 %v156_v8 }
  0x31   :  { %295 = vmatprep.subr.mxu1 %v419_v0 }
  0x32   :  { %296 = vmatpush3.msra.mxu1 %v155_v9 }
  0x33   :  { %297 = vmatprep.subr.mxu1 %v419_v0 }
  0x34   :  { %298 = vmatpush3.msra.mxu1 %v154_v10 }
  0x35   :  { %299 = vmatprep.subr.mxu1 %v419_v0 }
  0x36   :  { %300 = vmatpush3.msra.mxu1 %v153_v11 }
  0x37   :  { %301 = vmatprep.subr.mxu1 %v419_v0 }
  0x38   :  { %302 = vmatpush3.msra.mxu1 %v152_v12 }
  0x39   :  { %303 = vmatprep.subr.mxu1 %v419_v0 }
  0x3a   :  { %304 = vmatpush3.msra.mxu1 %v151_v13 }
  0x3b   :  { %305 = vmatprep.subr.mxu1 %v419_v0 }
  0x3c   :  { %306 = vmatpush3.msra.mxu1 %v150_v14 }
  0x3d   :  { %307 = vmatprep.subr.mxu1 %v419_v0 }
  0x3e   :  { %308 = vmatpush3.msra.mxu1 %v149_v15 }
  0x3f   :  { %309 = vmatprep.subr.mxu1 %v419_v0 }
  0x40   :  { %310 = vmatpush3.msra.mxu1 %v148_v16 }
  0x41   :  { %311 = vmatprep.subr.mxu1 %v419_v0 }
  0x42   :  { %312 = vmatpush3.msra.mxu1 %v147_v17 }
  0x43   :  { %313 = vmatprep.subr.mxu1 %v419_v0 }
  0x44   :  { %314 = vmatpush3.msra.mxu1 %v146_v18 }
  0x45   :  { %315 = vmatprep.subr.mxu1 %v419_v0 }
  0x46   :  { %316 = vmatpush3.msra.mxu1 %v145_v19 }
  0xeb   :  { %v140_v21 = vpop.f32.mrf.mxu0 }
  0xec   :  { %v141_v22 = vadd.f32 %v255_v20, %v140_v21 }
  0xed   :  { %v284_v23 = vpop.f32.mrf.mxu0 }
  0xee   :  { %v144_v24 = vmax.f32 %v141_v22, 0.0 }
  0xf0   :  { %318 = vmatmul.mubr.f32.vlgmr.msra.gmra.mxu1 %v144_v24 }
 0x1b0   :  { %v234_v26 = vpop.f32.mrf.mxu1 }
 0x1b1   :  { %v235_v27 = vadd.f32 %v257_v25, %v234_v26 }
 0x1b2   :  { %v319_v28 = vpop.f32.mrf.mxu1 }
 0x1b3   :  { %238 = vst [vmem:[#allocation8] sm:$0xff] %v235_v27 }
 0x1b4   :  { %399 = shalt.err (!%p396_p5)
}
 0x1b5   :  { %248 = dma.vmem_to_hbm [thread:$0]  %s246_s12, 128, %s475_s5, [#allocation4]  }
 0x1b6   :  { %412 = dma.done.wait [#allocation4], 128  }
 0x1b7   :  { %413 = vsyncadd [#allocation4], 4294967168 }
 0x1b8   :  { %252 = vsyncpa [#allocation3], 1 }
 0x1b9   :  { %253 = vsyncpa [#allocation6], 1 }
 0x1ba   :  { %254 = vsyncpa [#allocation4], 1 }

</bundles_post_ra>
